<compile_context>
chip_gen: v7x
topology: tpu7x:2x2x1
jax: 0.10.0
libtpu: 0.0.40
codegen_flags: <defaults>
</compile_context>

<pallas_src>
import functools

import jax
import jax.numpy as jnp
from jax import lax
from jax.experimental import pallas as pl
from jax.experimental.pallas import tpu as pltpu

_LANE = 128
_TILE_BUDGET_BYTES = 2 * 1024 * 1024    # per-input-block VMEM budget (f32)
_MAX_TM = 8192                          # lane-tile cap (multiple of 128)
_FUSE_BUDGET_BYTES = 8 * 1024 * 1024    # total double-buffered input bytes for fused dice


def _pick_tile(nc, hw):
    """Lane-tile width: full extent if small, else a multiple of 128 keeping an
    (nc, tm) f32 block under the per-block VMEM budget."""
    cap = (_TILE_BUDGET_BYTES // (max(nc, 1) * 4)) // _LANE * _LANE
    cap = max(_LANE, min(_MAX_TM, cap))
    return hw if hw <= cap else cap


def _split_grid(num_tiles):
    """(parallel lane-chunks, tiles per chunk); 2-way split feeds both v7x cores."""
    if num_tiles >= 2 and num_tiles % 2 == 0:
        return 2, num_tiles // 2
    return 1, num_tiles


# ----------------------------------------------------------------------------
# Kernel 1: per-(n,c) dice sums for one or more scales in a single call.
#   refs = (pred_0, label_0, ..., pred_{S-1}, label_{S-1},
#           inter_0, union_0, ..., inter_{S-1}, union_{S-1})
#   pred/label blocks: (NC, tm_s)   inter/union blocks: (1, NC, 1) resident
#   accumulators across the k (arbitrary) grid axis.
# ----------------------------------------------------------------------------
def _dice_sums_kernel(*refs, hws, tms, k_steps):
    ns = len(hws)
    pc = pl.program_id(0)   # parallel lane-chunk
    k = pl.program_id(1)    # reduction step within the chunk

    for s in range(ns):
        pred_ref, label_ref = refs[2 * s], refs[2 * s + 1]
        inter_ref, union_ref = refs[2 * ns + 2 * s], refs[2 * ns + 2 * s + 1]

        @pl.when(k == 0)
        def _init(i_ref=inter_ref, u_ref=union_ref):
            i_ref[...] = jnp.zeros_like(i_ref)
            u_ref[...] = jnp.zeros_like(u_ref)

        p = jax.nn.sigmoid(pred_ref[...].astype(jnp.float32))
        l = label_ref[...].astype(jnp.float32)
        if hws[s] % tms[s] != 0:   # ragged last lane tile -> mask padding to zero
            col = lax.broadcasted_iota(jnp.int32, p.shape, 1) + (pc * k_steps + k) * tms[s]
            valid = col < hws[s]
            p = jnp.where(valid, p, 0.0)
            l = jnp.where(valid, l, 0.0)

        inter_ref[...] += jnp.sum(p * l, axis=-1, keepdims=True)[None]
        union_ref[...] += jnp.sum(p + l, axis=-1, keepdims=True)[None]


def _dice_sums_call(group):
    """One pallas_call over a list of (pred NCHW logits, label NCHW) pairs sharing
    N, C and the same lane-tile count. Returns [(inter_c, union_c)] per pair, each a
    per-channel (C,) f32 vector of sum(sigmoid(p)*l) / sum(sigmoid(p)+l)."""
    n, c = group[0][0].shape[0], group[0][0].shape[1]
    nc = n * c
    fused = len(group) > 1

    slabs, hws, tms = [], [], []
    for pred, label in group:
        assert pred.ndim == 4 and label.shape == pred.shape
        hw = pred.shape[2] * pred.shape[3]
        # free row-major reshape (no transpose/copy); native dtypes kept
        slabs.append((pred.reshape(nc, hw), label.reshape(nc, hw)))
        hws.append(hw)
        tms.append(hw if fused else _pick_tile(nc, hw))

    tile_counts = {-(-h // t) for h, t in zip(hws, tms)}
    assert len(tile_counts) == 1
    P, K = _split_grid(tile_counts.pop())

    def idx_in(pc, k):
        return (0, pc * K + k)

    def idx_out(pc, k):
        return (pc, 0, 0)

    in_specs, inputs, out_shape, out_specs = [], [], [], []
    for (p2, l2), tm in zip(slabs, tms):
        in_specs += [pl.BlockSpec((nc, tm), idx_in), pl.BlockSpec((nc, tm), idx_in)]
        inputs += [p2, l2]
        out_shape += [jax.ShapeDtypeStruct((P, nc, 1), jnp.float32)] * 2
        out_specs += [pl.BlockSpec((1, nc, 1), idx_out)] * 2

    elems = nc * sum(hws)
    bytes_in = sum(int(t.size) * t.dtype.itemsize for pair in group for t in pair)
    cost = pl.CostEstimate(flops=6 * elems, transcendentals=elems,
                           bytes_accessed=bytes_in)

    outs = pl.pallas_call(
        functools.partial(_dice_sums_kernel, hws=tuple(hws), tms=tuple(tms), k_steps=K),
        out_shape=tuple(out_shape),
        grid=(P, K),
        in_specs=in_specs,
        out_specs=tuple(out_specs),
        compiler_params=pltpu.CompilerParams(
            dimension_semantics=("parallel", "arbitrary")),
        cost_estimate=cost,
    )(*inputs)

    results = []
    for s in range(len(group)):
        inter_c = outs[2 * s].reshape(P * n, c).sum(axis=0)
        union_c = outs[2 * s + 1].reshape(P * n, c).sum(axis=0)
        results.append((inter_c, union_c))
    return results


def _dice_sums_multi(pairs):
    """Per-channel dice sums for a list of (pred, label) NCHW pairs. Fuses all
    scales into one pallas_call when small enough for full-extent blocks; otherwise
    each scale gets its own lane-tiled call."""
    same_nc = len({(p.shape[0], p.shape[1]) for p, _ in pairs}) == 1
    fits = sum(2 * 2 * 4 * p.shape[0] * p.shape[1] * p.shape[2] * p.shape[3]
               for p, _ in pairs) <= _FUSE_BUDGET_BYTES
    if same_nc and fits and len(pairs) > 1:
        return _dice_sums_call(list(pairs))
    results = []
    for pair in pairs:
        results.extend(_dice_sums_call([pair]))
    return results


def dice_loss_mean_pallas(pred, label):
    """Matches torch dice_loss_mean: 1 - mean_c(2*inter_c / (union_c + 1e-5))."""
    ((inter_c, union_c),) = _dice_sums_call([(pred, label)])
    iou = (2.0 * inter_c) / (union_c + 1e-5)
    return 1.0 - jnp.mean(iou)


# ----------------------------------------------------------------------------
# Kernel 2: L1 sum. |a-b| accumulated with plain VPU adds into a VMEM scratch,
# single cross-lane reduce at the last reduction step of each parallel chunk.
# ----------------------------------------------------------------------------
def _l1_sum_kernel(a_ref, b_ref, out_ref, acc_ref, *, hw, tm, k_steps):
    pc = pl.program_id(0)
    k = pl.program_id(1)

    @pl.when(k == 0)
    def _init():
        acc_ref[...] = jnp.zeros_like(acc_ref)

    d = jnp.abs(a_ref[...].astype(jnp.float32) - b_ref[...].astype(jnp.float32))
    if hw % tm != 0:   # ragged last lane tile
        col = lax.broadcasted_iota(jnp.int32, d.shape, 1) + (pc * k_steps + k) * tm
        d = jnp.where(col < hw, d, 0.0)
    acc_ref[...] += d                      # plain elementwise adds every step

    @pl.when(k == k_steps - 1)             # one cross-lane reduce per chunk
    def _finish():
        out_ref[...] = jnp.sum(acc_ref[...], axis=-1, keepdims=True)[None]


def _as_2d(x):
    """Free (row-major) 2-D view with a dense lane axis; no transpose / pad copies."""
    if x.ndim == 4:
        n, c, h, w = x.shape
        return x.reshape(n * c, h * w)
    if x.ndim >= 2:
        return x.reshape(-1, x.shape[-1])
    return x.reshape(1, -1)


def l1_loss_mean_pallas(pred, target):
    assert pred.shape == target.shape
    a2, b2 = _as_2d(pred), _as_2d(target)
    nc, hw = a2.shape
    numel = int(pred.size)

    tm = _pick_tile(nc, hw)
    P, K = _split_grid(-(-hw // tm))

    def idx_in(pc, k):
        return (0, pc * K + k)

    cost = pl.CostEstimate(flops=3 * numel, transcendentals=0,
                           bytes_accessed=2 * numel * pred.dtype.itemsize)

    partial_sums = pl.pallas_call(
        functools.partial(_l1_sum_kernel, hw=hw, tm=tm, k_steps=K),
        out_shape=jax.ShapeDtypeStruct((P, nc, 1), jnp.float32),
        grid=(P, K),
        in_specs=[pl.BlockSpec((nc, tm), idx_in),
                  pl.BlockSpec((nc, tm), idx_in)],
        out_specs=pl.BlockSpec((1, nc, 1), lambda pc, k: (pc, 0, 0)),
        scratch_shapes=[pltpu.VMEM((nc, tm), jnp.float32)],
        compiler_params=pltpu.CompilerParams(
            dimension_semantics=("parallel", "arbitrary")),
        cost_estimate=cost,
    )(a2, b2)

    return jnp.sum(partial_sums) / jnp.float32(numel)


# ----------------------------------------------------------------------------
# MultiTaskLoss forward
# ----------------------------------------------------------------------------
class MultiTaskLoss:
    def __init__(self, l1_reduction="mean"):
        # nn.Parameter(torch.zeros(2)) -> deterministic zeros at init
        self.log_vars = jnp.zeros((2,), dtype=jnp.float32)
        assert l1_reduction == "mean"
        self.l1_reduction = l1_reduction

    def __call__(self, preds, labels, bev, bev_pred):
        precision1 = jnp.exp(-self.log_vars[0])
        precision2 = jnp.exp(-self.log_vars[1])

        # all dice scales in (at most) one pallas_call; per-scale iou glue is tiny
        dice_l = jnp.float32(0.0)
        for inter_c, union_c in _dice_sums_multi(list(zip(preds, labels))):
            iou = (2.0 * inter_c) / (union_c + 1e-5)
            dice_l = dice_l + (1.0 - jnp.mean(iou))

        bev_l = l1_loss_mean_pallas(bev_pred, bev)

        total_loss = (precision1 * dice_l + self.log_vars[0]
                      + (precision2 * bev_l + self.log_vars[1]))
        # torch returns python floats for the trailing outputs; here 0-d arrays.
        return (total_loss, self.log_vars[0], self.log_vars[1], dice_l, bev_l)


if __name__ == "__main__":
    key = jax.random.PRNGKey(0)
    ks = jax.random.split(key, 8)

    N, C, H, W = 2, 4, 16, 16

    # multi-scale predictions (logits) and binary labels: full, 1/2, 1/4 resolution
    preds = (
        jax.random.normal(ks[0], (N, C, H, W), jnp.float32),
        jax.random.normal(ks[1], (N, C, H // 2, W // 2), jnp.float32),
        jax.random.normal(ks[2], (N, C, H // 4, W // 4), jnp.float32),
    )
    labels = (
        (jax.random.uniform(ks[3], (N, C, H, W)) > 0.5).astype(jnp.float32),
        (jax.random.uniform(ks[4], (N, C, H // 2, W // 2)) > 0.5).astype(jnp.float32),
        (jax.random.uniform(ks[5], (N, C, H // 4, W // 4)) > 0.5).astype(jnp.float32),
    )
    bev = jax.random.normal(ks[6], (N, C, H, W), jnp.float32)
    bev_pred = jax.random.normal(ks[7], (N, C, H, W), jnp.float32)

    loss_mod = MultiTaskLoss(l1_reduction="mean")
    loss_fn = jax.jit(lambda p, l, b, bp: loss_mod(p, l, b, bp))

    out = jax.block_until_ready(loss_fn(preds, labels, bev, bev_pred))
    total_loss, lv0, lv1, dice_l, bev_l = out
    assert jnp.isfinite(total_loss) and jnp.isfinite(dice_l) and jnp.isfinite(bev_l)
    print("KERNEL_OK")
</pallas_src>

<mosaic_0001>
module attributes {stable_mosaic.version = 11 : i64} {
  func.func @_dice_sums_kernel(%arg0: i32, %arg1: i32, %arg2: memref<8x256xf32, #tpu.memory_space<vmem>>, %arg3: memref<8x256xf32, #tpu.memory_space<vmem>>, %arg4: memref<8x64xf32, #tpu.memory_space<vmem>>, %arg5: memref<8x64xf32, #tpu.memory_space<vmem>>, %arg6: memref<8x16xf32, #tpu.memory_space<vmem>>, %arg7: memref<8x16xf32, #tpu.memory_space<vmem>>, %arg8: memref<1x8x1xf32, #tpu.memory_space<vmem>>, %arg9: memref<1x8x1xf32, #tpu.memory_space<vmem>>, %arg10: memref<1x8x1xf32, #tpu.memory_space<vmem>>, %arg11: memref<1x8x1xf32, #tpu.memory_space<vmem>>, %arg12: memref<1x8x1xf32, #tpu.memory_space<vmem>>, %arg13: memref<1x8x1xf32, #tpu.memory_space<vmem>>) attributes {dimension_semantics = [#tpu.dimension_semantics<parallel>, #tpu.dimension_semantics<arbitrary>], iteration_bounds = array<i64: 1, 1>, scalar_prefetch = 0 : i64, scratch_operands = 0 : i64, tpu.core_type = #tpu.core_type<tc>, window_params = [{transform_indices = @transform_0, window_bounds = array<i64: 8, 256>}, {transform_indices = @transform_1, window_bounds = array<i64: 8, 256>}, {transform_indices = @transform_2, window_bounds = array<i64: 8, 64>}, {transform_indices = @transform_3, window_bounds = array<i64: 8, 64>}, {transform_indices = @transform_4, window_bounds = array<i64: 8, 16>}, {transform_indices = @transform_5, window_bounds = array<i64: 8, 16>}, {transform_indices = @transform_6, window_bounds = array<i64: 1, 8, 1>}, {transform_indices = @transform_7, window_bounds = array<i64: 1, 8, 1>}, {transform_indices = @transform_8, window_bounds = array<i64: 1, 8, 1>}, {transform_indices = @transform_9, window_bounds = array<i64: 1, 8, 1>}, {transform_indices = @transform_10, window_bounds = array<i64: 1, 8, 1>}, {transform_indices = @transform_11, window_bounds = array<i64: 1, 8, 1>}]} {
    %c0_i32 = arith.constant 0 : i32
    %0 = arith.cmpi eq, %arg1, %c0_i32 : i32
    %1 = arith.extui %0 : i1 to i32
    %c0_i32_0 = arith.constant 0 : i32
    %2 = arith.cmpi ne, %1, %c0_i32_0 : i32
    scf.if %2 {
      %cst_60 = arith.constant 0.000000e+00 : f32
      %72 = vector.broadcast %cst_60 : f32 to vector<1x8x1xf32>
      %c0_61 = arith.constant 0 : index
      %c0_62 = arith.constant 0 : index
      %c0_63 = arith.constant 0 : index
      %73 = vector.load %arg8[%c0_61, %c0_62, %c0_63] : memref<1x8x1xf32, #tpu.memory_space<vmem>>, vector<1x8x1xf32>
      tpu.vector_store %arg8[%c0_61, %c0_62, %c0_63], %72 {strides = array<i32>} : memref<1x8x1xf32, #tpu.memory_space<vmem>>, vector<1x8x1xf32>,
      %cst_64 = arith.constant 0.000000e+00 : f32
      %74 = vector.broadcast %cst_64 : f32 to vector<1x8x1xf32>
      %c0_65 = arith.constant 0 : index
      %c0_66 = arith.constant 0 : index
      %c0_67 = arith.constant 0 : index
      %75 = vector.load %arg9[%c0_65, %c0_66, %c0_67] : memref<1x8x1xf32, #tpu.memory_space<vmem>>, vector<1x8x1xf32>
      tpu.vector_store %arg9[%c0_65, %c0_66, %c0_67], %74 {strides = array<i32>} : memref<1x8x1xf32, #tpu.memory_space<vmem>>, vector<1x8x1xf32>,
    } else {
    }
    %c0 = arith.constant 0 : index
    %c0_1 = arith.constant 0 : index
    %3 = vector.load %arg2[%c0, %c0_1] : memref<8x256xf32, #tpu.memory_space<vmem>>, vector<8x256xf32>
    %4 = arith.negf %3 : vector<8x256xf32>
    %5 = math.exp %4 : vector<8x256xf32>
    %cst = arith.constant 1.000000e+00 : f32
    %6 = vector.broadcast %cst : f32 to vector<8x256xf32>
    %7 = arith.addf %6, %5 : vector<8x256xf32>
    %8 = arith.divf %6, %7 : vector<8x256xf32>
    %c0_2 = arith.constant 0 : index
    %c0_3 = arith.constant 0 : index
    %9 = vector.load %arg3[%c0_2, %c0_3] : memref<8x256xf32, #tpu.memory_space<vmem>>, vector<8x256xf32>
    %c0_4 = arith.constant 0 : index
    %c0_5 = arith.constant 0 : index
    %c0_6 = arith.constant 0 : index
    %10 = vector.load %arg8[%c0_4, %c0_5, %c0_6] : memref<1x8x1xf32, #tpu.memory_space<vmem>>, vector<1x8x1xf32>
    %11 = arith.mulf %8, %9 : vector<8x256xf32>
    %cst_7 = arith.constant dense<0.000000e+00> : vector<8xf32>
    %12 = vector.multi_reduction <add>, %11, %cst_7 [1] : vector<8x256xf32> to vector<8xf32>
    %13 = vector.shape_cast %12 : vector<8xf32> to vector<8x1xf32>
    %14 = vector.shape_cast %13 : vector<8x1xf32> to vector<1x8x1xf32>
    %15 = arith.addf %10, %14 : vector<1x8x1xf32>
    %c0_8 = arith.constant 0 : index
    %c0_9 = arith.constant 0 : index
    %c0_10 = arith.constant 0 : index
    %16 = vector.load %arg8[%c0_8, %c0_9, %c0_10] : memref<1x8x1xf32, #tpu.memory_space<vmem>>, vector<1x8x1xf32>
    tpu.vector_store %arg8[%c0_8, %c0_9, %c0_10], %15 {strides = array<i32>} : memref<1x8x1xf32, #tpu.memory_space<vmem>>, vector<1x8x1xf32>,
    %c0_11 = arith.constant 0 : index
    %c0_12 = arith.constant 0 : index
    %c0_13 = arith.constant 0 : index
    %17 = vector.load %arg9[%c0_11, %c0_12, %c0_13] : memref<1x8x1xf32, #tpu.memory_space<vmem>>, vector<1x8x1xf32>
    %18 = arith.addf %8, %9 : vector<8x256xf32>
    %cst_14 = arith.constant dense<0.000000e+00> : vector<8xf32>
    %19 = vector.multi_reduction <add>, %18, %cst_14 [1] : vector<8x256xf32> to vector<8xf32>
    %20 = vector.shape_cast %19 : vector<8xf32> to vector<8x1xf32>
    %21 = vector.shape_cast %20 : vector<8x1xf32> to vector<1x8x1xf32>
    %22 = arith.addf %17, %21 : vector<1x8x1xf32>
    %c0_15 = arith.constant 0 : index
    %c0_16 = arith.constant 0 : index
    %c0_17 = arith.constant 0 : index
    %23 = vector.load %arg9[%c0_15, %c0_16, %c0_17] : memref<1x8x1xf32, #tpu.memory_space<vmem>>, vector<1x8x1xf32>
    tpu.vector_store %arg9[%c0_15, %c0_16, %c0_17], %22 {strides = array<i32>} : memref<1x8x1xf32, #tpu.memory_space<vmem>>, vector<1x8x1xf32>,
    %c0_i32_18 = arith.constant 0 : i32
    %24 = arith.cmpi eq, %arg1, %c0_i32_18 : i32
    %25 = arith.extui %24 : i1 to i32
    %c0_i32_19 = arith.constant 0 : i32
    %26 = arith.cmpi ne, %25, %c0_i32_19 : i32
    scf.if %26 {
      %cst_60 = arith.constant 0.000000e+00 : f32
      %72 = vector.broadcast %cst_60 : f32 to vector<1x8x1xf32>
      %c0_61 = arith.constant 0 : index
      %c0_62 = arith.constant 0 : index
      %c0_63 = arith.constant 0 : index
      %73 = vector.load %arg10[%c0_61, %c0_62, %c0_63] : memref<1x8x1xf32, #tpu.memory_space<vmem>>, vector<1x8x1xf32>
      tpu.vector_store %arg10[%c0_61, %c0_62, %c0_63], %72 {strides = array<i32>} : memref<1x8x1xf32, #tpu.memory_space<vmem>>, vector<1x8x1xf32>,
      %cst_64 = arith.constant 0.000000e+00 : f32
      %74 = vector.broadcast %cst_64 : f32 to vector<1x8x1xf32>
      %c0_65 = arith.constant 0 : index
      %c0_66 = arith.constant 0 : index
      %c0_67 = arith.constant 0 : index
      %75 = vector.load %arg11[%c0_65, %c0_66, %c0_67] : memref<1x8x1xf32, #tpu.memory_space<vmem>>, vector<1x8x1xf32>
      tpu.vector_store %arg11[%c0_65, %c0_66, %c0_67], %74 {strides = array<i32>} : memref<1x8x1xf32, #tpu.memory_space<vmem>>, vector<1x8x1xf32>,
    } else {
    }
    %c0_20 = arith.constant 0 : index
    %c0_21 = arith.constant 0 : index
    %27 = vector.load %arg4[%c0_20, %c0_21] : memref<8x64xf32, #tpu.memory_space<vmem>>, vector<8x64xf32>
    %28 = arith.negf %27 : vector<8x64xf32>
    %29 = math.exp %28 : vector<8x64xf32>
    %cst_22 = arith.constant 1.000000e+00 : f32
    %30 = vector.broadcast %cst_22 : f32 to vector<8x64xf32>
    %31 = arith.addf %30, %29 : vector<8x64xf32>
    %32 = arith.divf %30, %31 : vector<8x64xf32>
    %c0_23 = arith.constant 0 : index
    %c0_24 = arith.constant 0 : index
    %33 = vector.load %arg5[%c0_23, %c0_24] : memref<8x64xf32, #tpu.memory_space<vmem>>, vector<8x64xf32>
    %c0_25 = arith.constant 0 : index
    %c0_26 = arith.constant 0 : index
    %c0_27 = arith.constant 0 : index
    %34 = vector.load %arg10[%c0_25, %c0_26, %c0_27] : memref<1x8x1xf32, #tpu.memory_space<vmem>>, vector<1x8x1xf32>
    %35 = arith.mulf %32, %33 : vector<8x64xf32>
    %cst_28 = arith.constant dense<0.000000e+00> : vector<8xf32>
    %36 = vector.multi_reduction <add>, %35, %cst_28 [1] : vector<8x64xf32> to vector<8xf32>
    %37 = vector.shape_cast %36 : vector<8xf32> to vector<8x1xf32>
    %38 = vector.shape_cast %37 : vector<8x1xf32> to vector<1x8x1xf32>
    %39 = arith.addf %34, %38 : vector<1x8x1xf32>
    %c0_29 = arith.constant 0 : index
    %c0_30 = arith.constant 0 : index
    %c0_31 = arith.constant 0 : index
    %40 = vector.load %arg10[%c0_29, %c0_30, %c0_31] : memref<1x8x1xf32, #tpu.memory_space<vmem>>, vector<1x8x1xf32>
    tpu.vector_store %arg10[%c0_29, %c0_30, %c0_31], %39 {strides = array<i32>} : memref<1x8x1xf32, #tpu.memory_space<vmem>>, vector<1x8x1xf32>,
    %c0_32 = arith.constant 0 : index
    %c0_33 = arith.constant 0 : index
    %c0_34 = arith.constant 0 : index
    %41 = vector.load %arg11[%c0_32, %c0_33, %c0_34] : memref<1x8x1xf32, #tpu.memory_space<vmem>>, vector<1x8x1xf32>
    %42 = arith.addf %32, %33 : vector<8x64xf32>
    %cst_35 = arith.constant dense<0.000000e+00> : vector<8xf32>
    %43 = vector.multi_reduction <add>, %42, %cst_35 [1] : vector<8x64xf32> to vector<8xf32>
    %44 = vector.shape_cast %43 : vector<8xf32> to vector<8x1xf32>
    %45 = vector.shape_cast %44 : vector<8x1xf32> to vector<1x8x1xf32>
    %46 = arith.addf %41, %45 : vector<1x8x1xf32>
    %c0_36 = arith.constant 0 : index
    %c0_37 = arith.constant 0 : index
    %c0_38 = arith.constant 0 : index
    %47 = vector.load %arg11[%c0_36, %c0_37, %c0_38] : memref<1x8x1xf32, #tpu.memory_space<vmem>>, vector<1x8x1xf32>
    tpu.vector_store %arg11[%c0_36, %c0_37, %c0_38], %46 {strides = array<i32>} : memref<1x8x1xf32, #tpu.memory_space<vmem>>, vector<1x8x1xf32>,
    %c0_i32_39 = arith.constant 0 : i32
    %48 = arith.cmpi eq, %arg1, %c0_i32_39 : i32
    %49 = arith.extui %48 : i1 to i32
    %c0_i32_40 = arith.constant 0 : i32
    %50 = arith.cmpi ne, %49, %c0_i32_40 : i32
    scf.if %50 {
      %cst_60 = arith.constant 0.000000e+00 : f32
      %72 = vector.broadcast %cst_60 : f32 to vector<1x8x1xf32>
      %c0_61 = arith.constant 0 : index
      %c0_62 = arith.constant 0 : index
      %c0_63 = arith.constant 0 : index
      %73 = vector.load %arg12[%c0_61, %c0_62, %c0_63] : memref<1x8x1xf32, #tpu.memory_space<vmem>>, vector<1x8x1xf32>
      tpu.vector_store %arg12[%c0_61, %c0_62, %c0_63], %72 {strides = array<i32>} : memref<1x8x1xf32, #tpu.memory_space<vmem>>, vector<1x8x1xf32>,
      %cst_64 = arith.constant 0.000000e+00 : f32
      %74 = vector.broadcast %cst_64 : f32 to vector<1x8x1xf32>
      %c0_65 = arith.constant 0 : index
      %c0_66 = arith.constant 0 : index
      %c0_67 = arith.constant 0 : index
      %75 = vector.load %arg13[%c0_65, %c0_66, %c0_67] : memref<1x8x1xf32, #tpu.memory_space<vmem>>, vector<1x8x1xf32>
      tpu.vector_store %arg13[%c0_65, %c0_66, %c0_67], %74 {strides = array<i32>} : memref<1x8x1xf32, #tpu.memory_space<vmem>>, vector<1x8x1xf32>,
    } else {
    }
    %c0_41 = arith.constant 0 : index
    %c0_42 = arith.constant 0 : index
    %51 = vector.load %arg6[%c0_41, %c0_42] : memref<8x16xf32, #tpu.memory_space<vmem>>, vector<8x16xf32>
    %52 = arith.negf %51 : vector<8x16xf32>
    %53 = math.exp %52 : vector<8x16xf32>
    %cst_43 = arith.constant 1.000000e+00 : f32
    %54 = vector.broadcast %cst_43 : f32 to vector<8x16xf32>
    %55 = arith.addf %54, %53 : vector<8x16xf32>
    %56 = arith.divf %54, %55 : vector<8x16xf32>
    %c0_44 = arith.constant 0 : index
    %c0_45 = arith.constant 0 : index
    %57 = vector.load %arg7[%c0_44, %c0_45] : memref<8x16xf32, #tpu.memory_space<vmem>>, vector<8x16xf32>
    %c0_46 = arith.constant 0 : index
    %c0_47 = arith.constant 0 : index
    %c0_48 = arith.constant 0 : index
    %58 = vector.load %arg12[%c0_46, %c0_47, %c0_48] : memref<1x8x1xf32, #tpu.memory_space<vmem>>, vector<1x8x1xf32>
    %59 = arith.mulf %56, %57 : vector<8x16xf32>
    %cst_49 = arith.constant dense<0.000000e+00> : vector<8xf32>
    %60 = vector.multi_reduction <add>, %59, %cst_49 [1] : vector<8x16xf32> to vector<8xf32>
    %61 = vector.shape_cast %60 : vector<8xf32> to vector<8x1xf32>
    %62 = vector.shape_cast %61 : vector<8x1xf32> to vector<1x8x1xf32>
    %63 = arith.addf %58, %62 : vector<1x8x1xf32>
    %c0_50 = arith.constant 0 : index
    %c0_51 = arith.constant 0 : index
    %c0_52 = arith.constant 0 : index
    %64 = vector.load %arg12[%c0_50, %c0_51, %c0_52] : memref<1x8x1xf32, #tpu.memory_space<vmem>>, vector<1x8x1xf32>
    tpu.vector_store %arg12[%c0_50, %c0_51, %c0_52], %63 {strides = array<i32>} : memref<1x8x1xf32, #tpu.memory_space<vmem>>, vector<1x8x1xf32>,
    %c0_53 = arith.constant 0 : index
    %c0_54 = arith.constant 0 : index
    %c0_55 = arith.constant 0 : index
    %65 = vector.load %arg13[%c0_53, %c0_54, %c0_55] : memref<1x8x1xf32, #tpu.memory_space<vmem>>, vector<1x8x1xf32>
    %66 = arith.addf %56, %57 : vector<8x16xf32>
    %cst_56 = arith.constant dense<0.000000e+00> : vector<8xf32>
    %67 = vector.multi_reduction <add>, %66, %cst_56 [1] : vector<8x16xf32> to vector<8xf32>
    %68 = vector.shape_cast %67 : vector<8xf32> to vector<8x1xf32>
    %69 = vector.shape_cast %68 : vector<8x1xf32> to vector<1x8x1xf32>
    %70 = arith.addf %65, %69 : vector<1x8x1xf32>
    %c0_57 = arith.constant 0 : index
    %c0_58 = arith.constant 0 : index
    %c0_59 = arith.constant 0 : index
    %71 = vector.load %arg13[%c0_57, %c0_58, %c0_59] : memref<1x8x1xf32, #tpu.memory_space<vmem>>, vector<1x8x1xf32>
    tpu.vector_store %arg13[%c0_57, %c0_58, %c0_59], %70 {strides = array<i32>} : memref<1x8x1xf32, #tpu.memory_space<vmem>>, vector<1x8x1xf32>,
    return
  }
  func.func @transform_0(%arg0: i32, %arg1: i32) -> (i32, i32) {
    %c1_i32 = arith.constant 1 : i32
    %0 = arith.muli %arg0, %c1_i32 : i32
    %1 = arith.addi %0, %arg1 : i32
    %c0_i32 = arith.constant 0 : i32
    %c0_i32_0 = arith.constant 0 : i32
    return %c0_i32, %1 : i32, i32
  }
  func.func @transform_1(%arg0: i32, %arg1: i32) -> (i32, i32) {
    %c1_i32 = arith.constant 1 : i32
    %0 = arith.muli %arg0, %c1_i32 : i32
    %1 = arith.addi %0, %arg1 : i32
    %c0_i32 = arith.constant 0 : i32
    %c0_i32_0 = arith.constant 0 : i32
    return %c0_i32, %1 : i32, i32
  }
  func.func @transform_2(%arg0: i32, %arg1: i32) -> (i32, i32) {
    %c1_i32 = arith.constant 1 : i32
    %0 = arith.muli %arg0, %c1_i32 : i32
    %1 = arith.addi %0, %arg1 : i32
    %c0_i32 = arith.constant 0 : i32
    %c0_i32_0 = arith.constant 0 : i32
    return %c0_i32, %1 : i32, i32
  }
  func.func @transform_3(%arg0: i32, %arg1: i32) -> (i32, i32) {
    %c1_i32 = arith.constant 1 : i32
    %0 = arith.muli %arg0, %c1_i32 : i32
    %1 = arith.addi %0, %arg1 : i32
    %c0_i32 = arith.constant 0 : i32
    %c0_i32_0 = arith.constant 0 : i32
    return %c0_i32, %1 : i32, i32
  }
  func.func @transform_4(%arg0: i32, %arg1: i32) -> (i32, i32) {
    %c1_i32 = arith.constant 1 : i32
    %0 = arith.muli %arg0, %c1_i32 : i32
    %1 = arith.addi %0, %arg1 : i32
    %c0_i32 = arith.constant 0 : i32
    %c0_i32_0 = arith.constant 0 : i32
    return %c0_i32, %1 : i32, i32
  }
  func.func @transform_5(%arg0: i32, %arg1: i32) -> (i32, i32) {
    %c1_i32 = arith.constant 1 : i32
    %0 = arith.muli %arg0, %c1_i32 : i32
    %1 = arith.addi %0, %arg1 : i32
    %c0_i32 = arith.constant 0 : i32
    %c0_i32_0 = arith.constant 0 : i32
    return %c0_i32, %1 : i32, i32
  }
  func.func @transform_6(%arg0: i32, %arg1: i32) -> (i32, i32, i32) {
    %c0_i32 = arith.constant 0 : i32
    %c0_i32_0 = arith.constant 0 : i32
    %c0_i32_1 = arith.constant 0 : i32
    return %arg0, %c0_i32, %c0_i32_0 : i32, i32, i32
  }
  func.func @transform_7(%arg0: i32, %arg1: i32) -> (i32, i32, i32) {
    %c0_i32 = arith.constant 0 : i32
    %c0_i32_0 = arith.constant 0 : i32
    %c0_i32_1 = arith.constant 0 : i32
    return %arg0, %c0_i32, %c0_i32_0 : i32, i32, i32
  }
  func.func @transform_8(%arg0: i32, %arg1: i32) -> (i32, i32, i32) {
    %c0_i32 = arith.constant 0 : i32
    %c0_i32_0 = arith.constant 0 : i32
    %c0_i32_1 = arith.constant 0 : i32
    return %arg0, %c0_i32, %c0_i32_0 : i32, i32, i32
  }
  func.func @transform_9(%arg0: i32, %arg1: i32) -> (i32, i32, i32) {
    %c0_i32 = arith.constant 0 : i32
    %c0_i32_0 = arith.constant 0 : i32
    %c0_i32_1 = arith.constant 0 : i32
    return %arg0, %c0_i32, %c0_i32_0 : i32, i32, i32
  }
  func.func @transform_10(%arg0: i32, %arg1: i32) -> (i32, i32, i32) {
    %c0_i32 = arith.constant 0 : i32
    %c0_i32_0 = arith.constant 0 : i32
    %c0_i32_1 = arith.constant 0 : i32
    return %arg0, %c0_i32, %c0_i32_0 : i32, i32, i32
  }
  func.func @transform_11(%arg0: i32, %arg1: i32) -> (i32, i32, i32) {
    %c0_i32 = arith.constant 0 : i32
    %c0_i32_0 = arith.constant 0 : i32
    %c0_i32_1 = arith.constant 0 : i32
    return %arg0, %c0_i32, %c0_i32_0 : i32, i32, i32
  }
}

module attributes {stable_mosaic.version = 11 : i64} {
  func.func @_l1_sum_kernel(%arg0: i32, %arg1: i32, %arg2: memref<8x256xf32, #tpu.memory_space<vmem>>, %arg3: memref<8x256xf32, #tpu.memory_space<vmem>>, %arg4: memref<1x8x1xf32, #tpu.memory_space<vmem>>, %arg5: memref<8x256xf32, #tpu.memory_space<vmem>>) attributes {dimension_semantics = [#tpu.dimension_semantics<parallel>, #tpu.dimension_semantics<arbitrary>], iteration_bounds = array<i64: 1, 1>, scalar_prefetch = 0 : i64, scratch_operands = 1 : i64, tpu.core_type = #tpu.core_type<tc>, window_params = [{transform_indices = @transform_0, window_bounds = array<i64: 8, 256>}, {transform_indices = @transform_1, window_bounds = array<i64: 8, 256>}, {transform_indices = @transform_2, window_bounds = array<i64: 1, 8, 1>}]} {
    %c0_i32 = arith.constant 0 : i32
    %0 = arith.cmpi eq, %arg1, %c0_i32 : i32
    %1 = arith.extui %0 : i1 to i32
    %c0_i32_0 = arith.constant 0 : i32
    %2 = arith.cmpi ne, %1, %c0_i32_0 : i32
    scf.if %2 {
      %cst = arith.constant 0.000000e+00 : f32
      %13 = vector.broadcast %cst : f32 to vector<8x256xf32>
      %c0_10 = arith.constant 0 : index
      %c0_11 = arith.constant 0 : index
      %14 = vector.load %arg5[%c0_10, %c0_11] : memref<8x256xf32, #tpu.memory_space<vmem>>, vector<8x256xf32>
      tpu.vector_store %arg5[%c0_10, %c0_11], %13 {strides = array<i32>} : memref<8x256xf32, #tpu.memory_space<vmem>>, vector<8x256xf32>,
    } else {
    }
    %c0 = arith.constant 0 : index
    %c0_1 = arith.constant 0 : index
    %3 = vector.load %arg2[%c0, %c0_1] : memref<8x256xf32, #tpu.memory_space<vmem>>, vector<8x256xf32>
    %c0_2 = arith.constant 0 : index
    %c0_3 = arith.constant 0 : index
    %4 = vector.load %arg3[%c0_2, %c0_3] : memref<8x256xf32, #tpu.memory_space<vmem>>, vector<8x256xf32>
    %5 = arith.subf %3, %4 : vector<8x256xf32>
    %6 = math.absf %5 : vector<8x256xf32>
    %c0_4 = arith.constant 0 : index
    %c0_5 = arith.constant 0 : index
    %7 = vector.load %arg5[%c0_4, %c0_5] : memref<8x256xf32, #tpu.memory_space<vmem>>, vector<8x256xf32>
    %8 = arith.addf %7, %6 : vector<8x256xf32>
    %c0_6 = arith.constant 0 : index
    %c0_7 = arith.constant 0 : index
    %9 = vector.load %arg5[%c0_6, %c0_7] : memref<8x256xf32, #tpu.memory_space<vmem>>, vector<8x256xf32>
    tpu.vector_store %arg5[%c0_6, %c0_7], %8 {strides = array<i32>} : memref<8x256xf32, #tpu.memory_space<vmem>>, vector<8x256xf32>,
    %c0_i32_8 = arith.constant 0 : i32
    %10 = arith.cmpi eq, %arg1, %c0_i32_8 : i32
    %11 = arith.extui %10 : i1 to i32
    %c0_i32_9 = arith.constant 0 : i32
    %12 = arith.cmpi ne, %11, %c0_i32_9 : i32
    scf.if %12 {
      %c0_10 = arith.constant 0 : index
      %c0_11 = arith.constant 0 : index
      %13 = vector.load %arg5[%c0_10, %c0_11] : memref<8x256xf32, #tpu.memory_space<vmem>>, vector<8x256xf32>
      %cst = arith.constant dense<0.000000e+00> : vector<8xf32>
      %14 = vector.multi_reduction <add>, %13, %cst [1] : vector<8x256xf32> to vector<8xf32>
      %15 = vector.shape_cast %14 : vector<8xf32> to vector<8x1xf32>
      %16 = vector.shape_cast %15 : vector<8x1xf32> to vector<1x8x1xf32>
      %c0_12 = arith.constant 0 : index
      %c0_13 = arith.constant 0 : index
      %c0_14 = arith.constant 0 : index
      %17 = vector.load %arg4[%c0_12, %c0_13, %c0_14] : memref<1x8x1xf32, #tpu.memory_space<vmem>>, vector<1x8x1xf32>
      tpu.vector_store %arg4[%c0_12, %c0_13, %c0_14], %16 {strides = array<i32>} : memref<1x8x1xf32, #tpu.memory_space<vmem>>, vector<1x8x1xf32>,
    } else {
    }
    return
  }
  func.func @transform_0(%arg0: i32, %arg1: i32) -> (i32, i32) {
    %c1_i32 = arith.constant 1 : i32
    %0 = arith.muli %arg0, %c1_i32 : i32
    %1 = arith.addi %0, %arg1 : i32
    %c0_i32 = arith.constant 0 : i32
    %c0_i32_0 = arith.constant 0 : i32
    return %c0_i32, %1 : i32, i32
  }
  func.func @transform_1(%arg0: i32, %arg1: i32) -> (i32, i32) {
    %c1_i32 = arith.constant 1 : i32
    %0 = arith.muli %arg0, %c1_i32 : i32
    %1 = arith.addi %0, %arg1 : i32
    %c0_i32 = arith.constant 0 : i32
    %c0_i32_0 = arith.constant 0 : i32
    return %c0_i32, %1 : i32, i32
  }
  func.func @transform_2(%arg0: i32, %arg1: i32) -> (i32, i32, i32) {
    %c0_i32 = arith.constant 0 : i32
    %c0_i32_0 = arith.constant 0 : i32
    %c0_i32_1 = arith.constant 0 : i32
    return %arg0, %c0_i32, %c0_i32_0 : i32, i32, i32
  }
}

</mosaic_0001>

<bundles_post_ra>
// kernel: _lambda_.3
= control target key start
LH: loop header
LB: loop body
LE: loop exit
PB: predicated region body
PF: predicated region fallthrough
CT: control target
= control target key end

     0   :  { %vm83_vm0 = vcmask 7168   ;;  %s131_s0 = inlined_call_operand.vmem [shape: f32[8,256], index: 0, kind: input, shape index: {}]   ;;  %s132_s1 = inlined_call_operand.vmem [shape: f32[8,256], index: 1, kind: input, shape index: {}]   ;;  %s133_s2 = inlined_call_operand.vmem [shape: f32[1,8,1], index: 2, kind: output, shape index: {}]  }
   0x1   :  { %v61_v0 = vld [vmem:[%s131_s0] sm:$0xff]  ;;  %v62_v1 = vld [vmem:[%s131_s0 + $0x8] sm:$0xff] }
   0x2   :  { %v63_v2 = vld [vmem:[%s132_s1] sm:$0xff]  ;;  %v64_v3 = vld [vmem:[%s132_s1 + $0x8] sm:$0xff] }
   0x3   :  { %v65_v4 = vsub.f32 %v61_v0, %v63_v2  ;;  %v66_v5 = vsub.f32 %v62_v1, %v64_v3 }
   0x5   :  { %v67_v6 = vand.u32 2147483647, %v65_v4  ;;  %v68_v7 = vand.u32 2147483647, %v66_v5 }
   0x7   :  { %v80_v8 = vadd.f32 %v68_v7, %v67_v6 }
   0x9   :  { %81 = vadd.xlane.f32.xlu0 %v80_v8 }
  0x96   :  { %v82_v9 = vpop.xlane.xlu0 %81 }
  0x97   :  { %84 = vst.msk [vmem:[%s133_s2] sm:$0xff] %vm83_vm0, %v82_v9 }

// kernel: _lambda_.2
= control target key start
LH: loop header
LB: loop body
LE: loop exit
PB: predicated region body
PF: predicated region fallthrough
CT: control target
= control target key end

     0   :  { %vm145_vm0 = vcmask 7168   ;;  %v318_v2 = vmov 0.0   ;;  %vm196_vm1 = vcmask 523264   ;;  %vm224_vm2 = vcmask 130048   ;;  %s475_s2 = inlined_call_operand.vmem [shape: f32[8,64], index: 2, kind: input, shape index: {}]   ;;  %s476_s0 = inlined_call_operand.vmem [shape: f32[8,256], index: 0, kind: input, shape index: {}]   ;;  %s477_s4 = inlined_call_operand.vmem [shape: f32[8,16], index: 4, kind: input, shape index: {}]   ;;  %s478_s8 = inlined_call_operand.vmem [shape: f32[1,8,1], index: 8, kind: output, shape index: {2}]   ;;  %s479_s3 = inlined_call_operand.vmem [shape: f32[8,64], index: 3, kind: input, shape index: {}]   ;;  %s480_s1 = inlined_call_operand.vmem [shape: f32[8,256], index: 1, kind: input, shape index: {}]   ;;  %s481_s5 = inlined_call_operand.vmem [shape: f32[8,16], index: 5, kind: input, shape index: {}]   ;;  %s482_s6 = inlined_call_operand.vmem [shape: f32[1,8,1], index: 6, kind: output, shape index: {0}]   ;;  %s483_s9 = inlined_call_operand.vmem [shape: f32[1,8,1], index: 9, kind: output, shape index: {3}]   ;;  %s484_s7 = inlined_call_operand.vmem [shape: f32[1,8,1], index: 7, kind: output, shape index: {1}]   ;;  %s485_s11 = inlined_call_operand.vmem [shape: f32[1,8,1], index: 11, kind: output, shape index: {5}]   ;;  %s486_s10 = inlined_call_operand.vmem [shape: f32[1,8,1], index: 10, kind: output, shape index: {4}]  }
   0x1   :  { %v186_v0 = vld [vmem:[%s475_s2] sm:$0xff]  ;;  %184 = vst.msk [vmem:[%s478_s8] sm:$0xff] %vm145_vm0, %v318_v2  ;;  %v149_v4 = vld [vmem:[%s476_s0 + $0x8] sm:$0xff]  ;;  %146 = vst.msk [vmem:[%s482_s6] sm:$0xff] %vm145_vm0, %v318_v2 }
   0x2   :  { %v148_v1 = vld [vmem:[%s476_s0] sm:$0xff]  ;;  %v299_v3 = vmul.f32 -1.442695, %v186_v0  ;;  %v298_v6 = vmul.f32 -1.442695, %v149_v4  ;;  %v163_v20 = vld [vmem:[%s480_s1 + $0x8] sm:$0xff] }
   0x3   :  { %v297_v5 = vmul.f32 -1.442695, %v148_v1  ;;  %v214_v7 = vld [vmem:[%s477_s4] sm:$0xff]  ;;  %185 = vst.msk [vmem:[%s483_s9] sm:$0xff] %vm145_vm0, %v318_v2  ;;  %147 = vst.msk [vmem:[%s484_s7] sm:$0xff] %vm145_vm0, %v318_v2 }
   0x4   :  { %302 = vpow2.f32 %v299_v3  ;;  %v300_v8 = vmul.f32 -1.442695, %v214_v7  ;;  %v193_v17 = vld [vmem:[%s479_s3] sm:$0xff]  ;;  %213 = vst.msk [vmem:[%s485_s11] sm:$0xff] %vm145_vm0, %v318_v2  ;;  %212 = vst.msk [vmem:[%s486_s10] sm:$0xff] %vm145_vm0, %v318_v2 }
   0x5   :  { %304 = vpow2.f32 %v297_v5  ;;  %v162_v18 = vld [vmem:[%s480_s1] sm:$0xff] }
   0x6   :  { %306 = vpow2.f32 %v298_v6  ;;  %v221_v26 = vld [vmem:[%s481_s5] sm:$0xff] }
   0x7   :  { %308 = vpow2.f32 %v300_v8 }
   0x8   :  { %v194_v39 = vld [vmem:[%s478_s8] sm:$0xff] }
   0x9   :  { %v164_v42 = vld [vmem:[%s482_s6] sm:$0xff] }
   0xa   :  { %v202_v43 = vld [vmem:[%s483_s9] sm:$0xff] }
   0xb   :  { %v173_v48 = vld [vmem:[%s484_s7] sm:$0xff] }
   0xc   :  { %v230_v49 = vld [vmem:[%s485_s11] sm:$0xff] }
   0xd   :  { %v222_v54 = vld [vmem:[%s486_s10] sm:$0xff] }
   0xe   :  { %v303_v9 = vpop.eup %302 }
   0xf   :  { %v305_v10 = vpop.eup %304  ;;  %v190_v11 = vadd.f32 1.0, %v303_v9 }
  0x10   :  { %v307_v12 = vpop.eup %306  ;;  %v156_v13 = vadd.f32 1.0, %v305_v10 }
  0x11   :  { %v309_v14 = vpop.eup %308  ;;  %310 = vrcp.f32 %v190_v11  ;;  %v157_v15 = vadd.f32 1.0, %v307_v12 }
  0x12   :  { %312 = vrcp.f32 %v156_v13  ;;  %v218_v16 = vadd.f32 1.0, %v309_v14 }
  0x13   :  { %314 = vrcp.f32 %v157_v15 }
  0x14   :  { %316 = vrcp.f32 %v218_v16 }
  0x1b   :  { %v311_v19 = vpop.eup %310 }
  0x1c   :  { %v313_v21 = vpop.eup %312  ;;  %v195_v22 = vmul.f32 %v311_v19, %v193_v17  ;;  %v203_v23 = vadd.f32 %v311_v19, %v193_v17 }
  0x1d   :  { %v315_v24 = vpop.eup %314  ;;  %v165_v25 = vmul.f32 %v313_v21, %v162_v18  ;;  %v174_v30 = vadd.f32 %v313_v21, %v162_v18 }
  0x1e   :  { %v317_v27 = vpop.eup %316  ;;  %v197_v28 = vsel %vm196_vm1, %v195_v22, 0.0  ;;  %v166_v29 = vmul.f32 %v315_v24, %v163_v20  ;;  %v175_v31 = vadd.f32 %v315_v24, %v163_v20  ;;  %v204_v33 = vsel %vm196_vm1, %v203_v23, 0.0 }
  0x1f   :  { %198 = vadd.xlane.f32.xlu1 %v197_v28  ;;  %v231_v34 = vadd.f32 %v317_v27, %v221_v26  ;;  %v223_v36 = vmul.f32 %v317_v27, %v221_v26 }
  0x20   :  { %v167_v32 = vadd.f32 %v166_v29, %v165_v25  ;;  %v176_v35 = vadd.f32 %v175_v31, %v174_v30 }
  0x21   :  { %v232_v37 = vsel %vm224_vm2, %v231_v34, 0.0  ;;  %v225_v38 = vsel %vm224_vm2, %v223_v36, 0.0 }
  0x22   :  { %168 = vadd.xlane.f32.xlu0 %v167_v32 }
  0x23   :  { %205 = vadd.xlane.f32.xlu1 %v204_v33 }
  0x26   :  { %177 = vadd.xlane.f32.xlu0 %v176_v35 }
  0x27   :  { %233 = vadd.xlane.f32.xlu1 %v232_v37 }
  0x2a   :  { %226 = vadd.xlane.f32.xlu0 %v225_v38 }
  0xac   :  { %v199_v40 = vpop.xlane.xlu1 %198 }
  0xad   :  { %v200_v41 = vadd.f32 %v199_v40, %v194_v39 }
  0xaf   :  { %201 = vst.msk [vmem:[%s478_s8] sm:$0xff] %vm145_vm0, %v200_v41  ;;  %v169_v44 = vpop.xlane.xlu0 %168 }
  0xb0   :  { %v170_v45 = vadd.f32 %v169_v44, %v164_v42  ;;  %v206_v46 = vpop.xlane.xlu1 %205 }
  0xb1   :  { %v207_v47 = vadd.f32 %v206_v46, %v202_v43 }
  0xb2   :  { %172 = vst.msk [vmem:[%s482_s6] sm:$0xff] %vm145_vm0, %v170_v45 }
  0xb3   :  { %208 = vst.msk [vmem:[%s483_s9] sm:$0xff] %vm145_vm0, %v207_v47  ;;  %v178_v50 = vpop.xlane.xlu0 %177 }
  0xb4   :  { %v179_v51 = vadd.f32 %v178_v50, %v173_v48  ;;  %v234_v52 = vpop.xlane.xlu1 %233 }
  0xb5   :  { %v235_v53 = vadd.f32 %v234_v52, %v230_v49 }
  0xb6   :  { %180 = vst.msk [vmem:[%s484_s7] sm:$0xff] %vm145_vm0, %v179_v51 }
  0xb7   :  { %236 = vst.msk [vmem:[%s485_s11] sm:$0xff] %vm145_vm0, %v235_v53  ;;  %v227_v55 = vpop.xlane.xlu0 %226 }
  0xb8   :  { %v228_v56 = vadd.f32 %v227_v55, %v222_v54 }
  0xba   :  { %229 = vst.msk [vmem:[%s486_s10] sm:$0xff] %vm145_vm0, %v228_v56 }

</bundles_post_ra>
